<compile_context>
chip_gen: v7x
topology: tpu7x:2x2x1
jax: 0.10.0
libtpu: 0.0.40
codegen_flags: <defaults>
</compile_context>

<pallas_src>
import functools

import jax
import jax.numpy as jnp
from jax.experimental import pallas as pl
from jax.experimental.pallas import tpu as pltpu


def _round_up(v, m):
    return (v + m - 1) // m * m


def _fused_encoder_kernel(x_ref, w1_ref, w2_ref, b_ref, o_ref, *, n_blocks, residual):
    """One grid step = the FULL MAPEncoder applied to one batch tile.

    x_ref:  (batch_tile, D_pad)            input tile (streamed per grid step)
    w1_ref: (n_blocks, D_pad, D_pad)       VMEM-resident first-linear weights
    w2_ref: (n_blocks, D_pad, D_pad)       VMEM-resident second-linear weights
    b_ref:  (n_blocks, 2, D_pad)  f32      VMEM-resident biases (b1 row 0, b2 row 1)
    o_ref:  (batch_tile, D_pad)            output tile (lane-dense, 128-multiple)
    """
    h = x_ref[...].astype(jnp.float32)  # f32 carry, lives in vregs across blocks

    for blk in range(n_blocks):  # n_blocks is small & static -> full unroll
        a = h.astype(w1_ref.dtype)  # bf16 (or f32) MXU inputs, f32 accumulate
        t = jnp.dot(a, w1_ref[blk], preferred_element_type=jnp.float32)
        t = jnp.maximum(t + b_ref[blk, 0:1, :], 0.0)
        t = jnp.dot(t.astype(w2_ref.dtype), w2_ref[blk],
                    preferred_element_type=jnp.float32)
        t = jnp.maximum(t + b_ref[blk, 1:2, :], 0.0)
        if residual and blk > 0:          # static: skip connection from block 2 on
            t = t + h
        h = t

    o_ref[...] = h.astype(o_ref.dtype)


def pack_map_encoder_params(params, *, param_dtype=jnp.bfloat16):
    """Pad/stack per-block parameters once. Cache the result outside the hot path.

    Returns a dict with:
      w1: (n_blocks, D_pad, D_pad) param_dtype
      w2: (n_blocks, D_pad, D_pad) param_dtype
      b : (n_blocks, 2, D_pad)     f32   (row 0 = b1, row 1 = b2)
    Zero padding keeps the valid region's math unchanged (ReLU(0)=0, zero
    weight rows/cols contribute nothing).
    """
    in_dim = params[0][0].shape[0]
    h_dim = params[0][2].shape[1]
    n_blocks = len(params)
    # TODO(synk): if round_up(in_dim,128) and round_up(h_dim,128) differ by >=2x,
    # split block 0's W1 out with its own (smaller) contraction extent instead of
    # padding it to the shared D_pad.
    D_pad = max(_round_up(in_dim, 128), _round_up(h_dim, 128))

    w1s, w2s, bs = [], [], []
    for (w1, b1, w2, b2) in params:
        w1p = jnp.zeros((D_pad, D_pad), param_dtype)
        w1p = w1p.at[:w1.shape[0], :w1.shape[1]].set(w1.astype(param_dtype))
        w2p = jnp.zeros((D_pad, D_pad), param_dtype)
        w2p = w2p.at[:w2.shape[0], :w2.shape[1]].set(w2.astype(param_dtype))
        bp = jnp.zeros((2, D_pad), jnp.float32)
        bp = bp.at[0, :b1.shape[1]].set(b1.reshape(-1).astype(jnp.float32))
        bp = bp.at[1, :b2.shape[1]].set(b2.reshape(-1).astype(jnp.float32))
        w1s.append(w1p)
        w2s.append(w2p)
        bs.append(bp)

    return dict(
        w1=jnp.stack(w1s), w2=jnp.stack(w2s), b=jnp.stack(bs),
        in_dim=in_dim, h_dim=h_dim, n_blocks=n_blocks, D_pad=D_pad,
    )


def map_encoder_forward(x, packed, residual=True, *, batch_tile=None):
    """MAPEncoder.forward: h = layer(h) + (h if residual and idx>0 else 0)."""
    B, in_dim = x.shape
    assert in_dim == packed["in_dim"]
    D_pad = packed["D_pad"]
    h_dim = packed["h_dim"]
    n_blocks = packed["n_blocks"]
    w1_stack, w2_stack, b_stack = packed["w1"], packed["w2"], packed["b"]

    # Pad batch to 8 sublanes; pick a tile that gives >=2 grid steps when
    # possible so the "parallel" axis spans both v7x TensorCores.
    B_pad = _round_up(B, 8)
    if batch_tile is None:
        if B_pad <= 8:
            batch_tile = B_pad
        else:
            batch_tile = min(512, _round_up(pl.cdiv(B_pad, 2), 8))
    B_pad = _round_up(B_pad, batch_tile)

    x_pad = jnp.zeros((B_pad, D_pad), x.dtype).at[:B, :in_dim].set(x)

    # Explicit VMEM budget: 2x (pipeliner buffering) of the resident params plus
    # double-buffered in/out activation tiles plus headroom.
    param_bytes = (w1_stack.size * w1_stack.dtype.itemsize
                   + w2_stack.size * w2_stack.dtype.itemsize
                   + b_stack.size * b_stack.dtype.itemsize)
    io_tile_bytes = batch_tile * D_pad * x_pad.dtype.itemsize
    vmem_needed = 2 * param_bytes + 2 * 2 * io_tile_bytes + (4 << 20)
    vmem_limit = int(min(max(vmem_needed, 32 << 20), 128 << 20))
    # TODO(synk): for very large h_dim (resident weight stack beyond ~40 MiB the
    # full-residency strategy no longer fits v7x's 64 MiB VMEM) tile the weight
    # N-dimension with an extra grid axis instead of keeping the stack resident.

    kernel = functools.partial(_fused_encoder_kernel,
                               n_blocks=n_blocks, residual=bool(residual))

    out = pl.pallas_call(
        kernel,
        out_shape=jax.ShapeDtypeStruct((B_pad, D_pad), x.dtype),
        grid=(B_pad // batch_tile,),
        in_specs=[
            pl.BlockSpec((batch_tile, D_pad), lambda i: (i, 0)),            # x tile
            pl.BlockSpec((n_blocks, D_pad, D_pad), lambda i: (0, 0, 0)),    # W1 (resident)
            pl.BlockSpec((n_blocks, D_pad, D_pad), lambda i: (0, 0, 0)),    # W2 (resident)
            pl.BlockSpec((n_blocks, 2, D_pad), lambda i: (0, 0, 0)),        # biases (resident)
        ],
        out_specs=pl.BlockSpec((batch_tile, D_pad), lambda i: (i, 0)),
        compiler_params=pltpu.CompilerParams(
            dimension_semantics=("parallel",),
            vmem_limit_bytes=vmem_limit,
        ),
    )(x_pad, w1_stack, w2_stack, b_stack)

    # Slice back to the valid region once (lane-dense write inside the kernel).
    return out[:B, :h_dim]


def init_map_encoder_params(key, in_dim, h_dim, n_blocks, dtype=jnp.float32):
    """Deterministic synthetic parameters (shapes match the PyTorch module)."""
    params = []
    d_in = in_dim
    for _ in range(n_blocks):
        key, k1, k2, k3, k4 = jax.random.split(key, 5)
        scale1 = 1.0 / jnp.sqrt(jnp.float32(d_in))
        scale2 = 1.0 / jnp.sqrt(jnp.float32(h_dim))
        w1 = jax.random.uniform(k1, (d_in, h_dim), dtype, -1.0, 1.0) * scale1
        b1 = jax.random.uniform(k2, (1, h_dim), dtype, -1.0, 1.0) * scale1
        w2 = jax.random.uniform(k3, (h_dim, h_dim), dtype, -1.0, 1.0) * scale2
        b2 = jax.random.uniform(k4, (1, h_dim), dtype, -1.0, 1.0) * scale2
        params.append((w1, b1, w2, b2))
        d_in = h_dim
    return params


def map_encoder_reference(x, params, residual=True):
    """Pure-JAX f32 reference (matches the PyTorch module)."""
    h = x
    for layer_idx, (w1, b1, w2, b2) in enumerate(params):
        r = h if (residual and layer_idx > 0) else 0.0
        t = jnp.maximum(h @ w1 + b1, 0.0)
        t = jnp.maximum(t @ w2 + b2, 0.0)
        h = t + r
    return h


if __name__ == "__main__":
    key = jax.random.PRNGKey(0)
    key, kx = jax.random.split(key)

    # MAPEncoder(in_dim=16, h_dim=32, out_dim=32, n_blocks=3)
    batch, in_dim, h_dim, n_blocks = 8, 16, 32, 3

    x = jax.random.normal(kx, (batch, in_dim), jnp.float32)
    params = init_map_encoder_params(key, in_dim, h_dim, n_blocks)
    y_ref = map_encoder_reference(x, params, residual=True)

    # Exact-precision path (f32 params): tight check against the reference.
    packed_f32 = pack_map_encoder_params(params, param_dtype=jnp.float32)
    y32 = jax.block_until_ready(map_encoder_forward(x, packed_f32, residual=True))
    assert y32.shape == (batch, h_dim)
    assert jnp.allclose(y32, y_ref, atol=1e-5, rtol=1e-5)

    # Production default (bf16 weights on the MXU, f32 accumulate): loose check.
    packed_bf16 = pack_map_encoder_params(params)  # param_dtype=bfloat16
    y16 = jax.block_until_ready(map_encoder_forward(x, packed_bf16, residual=True))
    assert y16.shape == (batch, h_dim)
    assert jnp.allclose(y16, y_ref, atol=5e-2, rtol=5e-2)

    print("KERNEL_OK")
</pallas_src>

<mosaic_0001>
module attributes {stable_mosaic.version = 11 : i64} {
  func.func @_fused_encoder_kernel(%arg0: i32, %arg1: memref<8x128xf32, #tpu.memory_space<vmem>>, %arg2: memref<3x128x128xf32, #tpu.memory_space<vmem>>, %arg3: memref<3x128x128xf32, #tpu.memory_space<vmem>>, %arg4: memref<3x2x128xf32, #tpu.memory_space<vmem>>, %arg5: memref<8x128xf32, #tpu.memory_space<vmem>>) attributes {dimension_semantics = [#tpu.dimension_semantics<parallel>], iteration_bounds = array<i64: 1>, scalar_prefetch = 0 : i64, scratch_operands = 0 : i64, tpu.core_type = #tpu.core_type<tc>, window_params = [{transform_indices = @transform_0, window_bounds = array<i64: 8, 128>}, {pipeline_mode = #tpu.pipeline_mode<synchronous>, transform_indices = @transform_1, window_bounds = array<i64: 3, 128, 128>}, {pipeline_mode = #tpu.pipeline_mode<synchronous>, transform_indices = @transform_2, window_bounds = array<i64: 3, 128, 128>}, {pipeline_mode = #tpu.pipeline_mode<synchronous>, transform_indices = @transform_3, window_bounds = array<i64: 3, 2, 128>}, {transform_indices = @transform_4, window_bounds = array<i64: 8, 128>}]} {
    %c0 = arith.constant 0 : index
    %c0_0 = arith.constant 0 : index
    %0 = vector.load %arg1[%c0, %c0_0] : memref<8x128xf32, #tpu.memory_space<vmem>>, vector<8x128xf32>
    %c0_1 = arith.constant 0 : index
    %c0_2 = arith.constant 0 : index
    %c0_3 = arith.constant 0 : index
    %1 = vector.load %arg2[%c0_1, %c0_2, %c0_3] : memref<3x128x128xf32, #tpu.memory_space<vmem>>, vector<1x128x128xf32>
    %2 = vector.shape_cast %1 : vector<1x128x128xf32> to vector<128x128xf32>
    %cst = arith.constant dense<0.000000e+00> : vector<8x128xf32>
    %3 = tpu.matmul %0, %2, %cst {dimension_numbers = #tpu.dot_dimension_numbers<[1], [0], [0], [1], [0, 0, 1, 1], [], []>} : vector<8x128xf32>, vector<128x128xf32>, vector<8x128xf32> -> vector<8x128xf32>
    %c0_4 = arith.constant 0 : index
    %c0_5 = arith.constant 0 : index
    %c0_6 = arith.constant 0 : index
    %4 = vector.load %arg4[%c0_4, %c0_5, %c0_6] : memref<3x2x128xf32, #tpu.memory_space<vmem>>, vector<1x1x128xf32>
    %5 = vector.shape_cast %4 : vector<1x1x128xf32> to vector<1x128xf32>
    %6 = vector.broadcast %5 : vector<1x128xf32> to vector<8x128xf32>
    %7 = arith.addf %3, %6 : vector<8x128xf32>
    %cst_7 = arith.constant 0.000000e+00 : f32
    %8 = vector.broadcast %cst_7 : f32 to vector<8x128xf32>
    %9 = arith.maximumf %7, %8 : vector<8x128xf32>
    %c0_8 = arith.constant 0 : index
    %c0_9 = arith.constant 0 : index
    %c0_10 = arith.constant 0 : index
    %10 = vector.load %arg3[%c0_8, %c0_9, %c0_10] : memref<3x128x128xf32, #tpu.memory_space<vmem>>, vector<1x128x128xf32>
    %11 = vector.shape_cast %10 : vector<1x128x128xf32> to vector<128x128xf32>
    %cst_11 = arith.constant dense<0.000000e+00> : vector<8x128xf32>
    %12 = tpu.matmul %9, %11, %cst_11 {dimension_numbers = #tpu.dot_dimension_numbers<[1], [0], [0], [1], [0, 0, 1, 1], [], []>} : vector<8x128xf32>, vector<128x128xf32>, vector<8x128xf32> -> vector<8x128xf32>
    %c0_12 = arith.constant 0 : index
    %c1 = arith.constant 1 : index
    %c0_13 = arith.constant 0 : index
    %13 = vector.load %arg4[%c0_12, %c1, %c0_13] : memref<3x2x128xf32, #tpu.memory_space<vmem>>, vector<1x1x128xf32>
    %14 = vector.shape_cast %13 : vector<1x1x128xf32> to vector<1x128xf32>
    %15 = vector.broadcast %14 : vector<1x128xf32> to vector<8x128xf32>
    %16 = arith.addf %12, %15 : vector<8x128xf32>
    %cst_14 = arith.constant 0.000000e+00 : f32
    %17 = vector.broadcast %cst_14 : f32 to vector<8x128xf32>
    %18 = arith.maximumf %16, %17 : vector<8x128xf32>
    %c1_15 = arith.constant 1 : index
    %c0_16 = arith.constant 0 : index
    %c0_17 = arith.constant 0 : index
    %19 = vector.load %arg2[%c1_15, %c0_16, %c0_17] : memref<3x128x128xf32, #tpu.memory_space<vmem>>, vector<1x128x128xf32>
    %20 = vector.shape_cast %19 : vector<1x128x128xf32> to vector<128x128xf32>
    %cst_18 = arith.constant dense<0.000000e+00> : vector<8x128xf32>
    %21 = tpu.matmul %18, %20, %cst_18 {dimension_numbers = #tpu.dot_dimension_numbers<[1], [0], [0], [1], [0, 0, 1, 1], [], []>} : vector<8x128xf32>, vector<128x128xf32>, vector<8x128xf32> -> vector<8x128xf32>
    %c1_19 = arith.constant 1 : index
    %c0_20 = arith.constant 0 : index
    %c0_21 = arith.constant 0 : index
    %22 = vector.load %arg4[%c1_19, %c0_20, %c0_21] : memref<3x2x128xf32, #tpu.memory_space<vmem>>, vector<1x1x128xf32>
    %23 = vector.shape_cast %22 : vector<1x1x128xf32> to vector<1x128xf32>
    %24 = vector.broadcast %23 : vector<1x128xf32> to vector<8x128xf32>
    %25 = arith.addf %21, %24 : vector<8x128xf32>
    %cst_22 = arith.constant 0.000000e+00 : f32
    %26 = vector.broadcast %cst_22 : f32 to vector<8x128xf32>
    %27 = arith.maximumf %25, %26 : vector<8x128xf32>
    %c1_23 = arith.constant 1 : index
    %c0_24 = arith.constant 0 : index
    %c0_25 = arith.constant 0 : index
    %28 = vector.load %arg3[%c1_23, %c0_24, %c0_25] : memref<3x128x128xf32, #tpu.memory_space<vmem>>, vector<1x128x128xf32>
    %29 = vector.shape_cast %28 : vector<1x128x128xf32> to vector<128x128xf32>
    %cst_26 = arith.constant dense<0.000000e+00> : vector<8x128xf32>
    %30 = tpu.matmul %27, %29, %cst_26 {dimension_numbers = #tpu.dot_dimension_numbers<[1], [0], [0], [1], [0, 0, 1, 1], [], []>} : vector<8x128xf32>, vector<128x128xf32>, vector<8x128xf32> -> vector<8x128xf32>
    %c1_27 = arith.constant 1 : index
    %c1_28 = arith.constant 1 : index
    %c0_29 = arith.constant 0 : index
    %31 = vector.load %arg4[%c1_27, %c1_28, %c0_29] : memref<3x2x128xf32, #tpu.memory_space<vmem>>, vector<1x1x128xf32>
    %32 = vector.shape_cast %31 : vector<1x1x128xf32> to vector<1x128xf32>
    %33 = vector.broadcast %32 : vector<1x128xf32> to vector<8x128xf32>
    %34 = arith.addf %30, %33 : vector<8x128xf32>
    %cst_30 = arith.constant 0.000000e+00 : f32
    %35 = vector.broadcast %cst_30 : f32 to vector<8x128xf32>
    %36 = arith.maximumf %34, %35 : vector<8x128xf32>
    %37 = arith.addf %36, %18 : vector<8x128xf32>
    %c2 = arith.constant 2 : index
    %c0_31 = arith.constant 0 : index
    %c0_32 = arith.constant 0 : index
    %38 = vector.load %arg2[%c2, %c0_31, %c0_32] : memref<3x128x128xf32, #tpu.memory_space<vmem>>, vector<1x128x128xf32>
    %39 = vector.shape_cast %38 : vector<1x128x128xf32> to vector<128x128xf32>
    %cst_33 = arith.constant dense<0.000000e+00> : vector<8x128xf32>
    %40 = tpu.matmul %37, %39, %cst_33 {dimension_numbers = #tpu.dot_dimension_numbers<[1], [0], [0], [1], [0, 0, 1, 1], [], []>} : vector<8x128xf32>, vector<128x128xf32>, vector<8x128xf32> -> vector<8x128xf32>
    %c2_34 = arith.constant 2 : index
    %c0_35 = arith.constant 0 : index
    %c0_36 = arith.constant 0 : index
    %41 = vector.load %arg4[%c2_34, %c0_35, %c0_36] : memref<3x2x128xf32, #tpu.memory_space<vmem>>, vector<1x1x128xf32>
    %42 = vector.shape_cast %41 : vector<1x1x128xf32> to vector<1x128xf32>
    %43 = vector.broadcast %42 : vector<1x128xf32> to vector<8x128xf32>
    %44 = arith.addf %40, %43 : vector<8x128xf32>
    %cst_37 = arith.constant 0.000000e+00 : f32
    %45 = vector.broadcast %cst_37 : f32 to vector<8x128xf32>
    %46 = arith.maximumf %44, %45 : vector<8x128xf32>
    %c2_38 = arith.constant 2 : index
    %c0_39 = arith.constant 0 : index
    %c0_40 = arith.constant 0 : index
    %47 = vector.load %arg3[%c2_38, %c0_39, %c0_40] : memref<3x128x128xf32, #tpu.memory_space<vmem>>, vector<1x128x128xf32>
    %48 = vector.shape_cast %47 : vector<1x128x128xf32> to vector<128x128xf32>
    %cst_41 = arith.constant dense<0.000000e+00> : vector<8x128xf32>
    %49 = tpu.matmul %46, %48, %cst_41 {dimension_numbers = #tpu.dot_dimension_numbers<[1], [0], [0], [1], [0, 0, 1, 1], [], []>} : vector<8x128xf32>, vector<128x128xf32>, vector<8x128xf32> -> vector<8x128xf32>
    %c2_42 = arith.constant 2 : index
    %c1_43 = arith.constant 1 : index
    %c0_44 = arith.constant 0 : index
    %50 = vector.load %arg4[%c2_42, %c1_43, %c0_44] : memref<3x2x128xf32, #tpu.memory_space<vmem>>, vector<1x1x128xf32>
    %51 = vector.shape_cast %50 : vector<1x1x128xf32> to vector<1x128xf32>
    %52 = vector.broadcast %51 : vector<1x128xf32> to vector<8x128xf32>
    %53 = arith.addf %49, %52 : vector<8x128xf32>
    %cst_45 = arith.constant 0.000000e+00 : f32
    %54 = vector.broadcast %cst_45 : f32 to vector<8x128xf32>
    %55 = arith.maximumf %53, %54 : vector<8x128xf32>
    %56 = arith.addf %55, %37 : vector<8x128xf32>
    %c0_46 = arith.constant 0 : index
    %c0_47 = arith.constant 0 : index
    %57 = vector.load %arg5[%c0_46, %c0_47] : memref<8x128xf32, #tpu.memory_space<vmem>>, vector<8x128xf32>
    tpu.vector_store %arg5[%c0_46, %c0_47], %56 {strides = array<i32>} : memref<8x128xf32, #tpu.memory_space<vmem>>, vector<8x128xf32>,
    return
  }
  func.func @transform_0(%arg0: i32) -> (i32, i32) {
    %c0_i32 = arith.constant 0 : i32
    %c0_i32_0 = arith.constant 0 : i32
    return %arg0, %c0_i32 : i32, i32
  }
  func.func @transform_1(%arg0: i32) -> (i32, i32, i32) {
    %c0_i32 = arith.constant 0 : i32
    %c0_i32_0 = arith.constant 0 : i32
    %c0_i32_1 = arith.constant 0 : i32
    %c0_i32_2 = arith.constant 0 : i32
    return %c0_i32, %c0_i32_0, %c0_i32_1 : i32, i32, i32
  }
  func.func @transform_2(%arg0: i32) -> (i32, i32, i32) {
    %c0_i32 = arith.constant 0 : i32
    %c0_i32_0 = arith.constant 0 : i32
    %c0_i32_1 = arith.constant 0 : i32
    %c0_i32_2 = arith.constant 0 : i32
    return %c0_i32, %c0_i32_0, %c0_i32_1 : i32, i32, i32
  }
  func.func @transform_3(%arg0: i32) -> (i32, i32, i32) {
    %c0_i32 = arith.constant 0 : i32
    %c0_i32_0 = arith.constant 0 : i32
    %c0_i32_1 = arith.constant 0 : i32
    %c0_i32_2 = arith.constant 0 : i32
    return %c0_i32, %c0_i32_0, %c0_i32_1 : i32, i32, i32
  }
  func.func @transform_4(%arg0: i32) -> (i32, i32) {
    %c0_i32 = arith.constant 0 : i32
    %c0_i32_0 = arith.constant 0 : i32
    return %arg0, %c0_i32 : i32, i32
  }
}

</mosaic_0001>

<bundles_post_ra>
// kernel: tpu_custom_call.1
= control target key start
LH: loop header
LB: loop body
LE: loop exit
PB: predicated region body
PF: predicated region fallthrough
CT: control target
= control target key end

     0   :  { %9 = vsyncpa [#allocation3], 0  ;;  %s1377_s0 = inlined_call_operand.hbm [shape: f32[8,128], index: 0, kind: input, shape index: {}]   ;;  %s1378_s1 = inlined_call_operand.hbm [shape: f32[3,128,128], index: 1, kind: input, shape index: {}]   ;;  %s1379_s2 = inlined_call_operand.hbm [shape: f32[3,128,128], index: 2, kind: input, shape index: {}]   ;;  %s1380_s3 = inlined_call_operand.vmem [shape: f32[3,2,128], index: 3, kind: input, shape index: {}]   ;;  %s1381_s4 = inlined_call_operand.hbm [shape: f32[8,128], index: 4, kind: output, shape index: {}]  }
   0x1   :  { %10 = vsyncpa [#allocation6], 0 }
   0x2   :  { %11 = vsyncpa [#allocation4], 0  ;;  %s1204_s15 = smov [#allocation5]   ;;  %s1110_s19 = scalar_lea.hbm %s1378_s1, 6144 }
   0x3   :  { %s27_s16 = sshll.u32 %s1204_s15, 4  ;;  %p1111_p0 = scmp.ne.s32.totalorder %s1378_s1, %s1110_s19  ;;  %s28_s16 = int_to_ptr.vmem [resolvable:$true] %s27_s16 }
   0x4   :  { %p1114_p1 = scmp.lt.u32.totalorder %s1110_s19, %s1378_s1 }
   0x6   :  { %p1116_p2 = pnand %p1114_p1, %p1111_p0 }
   0x8   :  { %1119 = shalt.err (!%p1116_p2)
}
   0x9   :  { %s1120_s24 = scalar_lea.vmem %s28_s16, 6144  ;;  %p1125_p4 = scmp.lt.s32.totalorder %s28_s16, %s28_s16 }
   0xa   :  { %p1121_p3 = scmp.ne.s32.totalorder %s28_s16, %s1120_s24  ;;  %p1126_p5 = scmp.lt.s32.totalorder %s1120_s24, %s1120_s24 }
   0xc   :  { %p1127_p6 = por %p1126_p5, %p1125_p4 }
   0xe   :  { %p1128_p7 = pnand %p1127_p6, %p1121_p3 }
  0x10   :  { %1131 = shalt.err (!%p1128_p7)
}
  0x11   :  { %s1205_s25 = smov 128   ;;  %s1206_s26 = smov 8  }
  0x12   :  { %33 = dma.hbm_to_vmem [thread:$0]  %s1378_s1, 6144, %s28_s16, [#allocation6], %s1205_s25, %s1205_s25, %s1206_s26  }
  0x13   :  { %s1207_s29 = smov [#allocation2]   ;;  %s1208_s5 = smov [#allocation7]  }
  0x14   :  { %s18_s30 = sshll.u32 %s1207_s29, 4  ;;  %s39_s6 = sshll.u32 %s1208_s5, 4  ;;  %s19_s30 = int_to_ptr.vmem [resolvable:$true] %s18_s30  ;;  %s40_s6 = int_to_ptr.vmem [resolvable:$true] %s39_s6 }
  0x15   :  { %s1132_s9 = scalar_lea.hbm %s1377_s0, 128 }
  0x16   :  { %p1133_p8 = scmp.ne.s32.totalorder %s1377_s0, %s1132_s9  ;;  %p1136_p9 = scmp.lt.u32.totalorder %s1132_s9, %s1377_s0 }
  0x18   :  { %p1138_p10 = pnand %p1136_p9, %p1133_p8 }
  0x1a   :  { %1141 = shalt.err (!%p1138_p10)
}
  0x1b   :  { %s1142_s1 = scalar_lea.vmem %s19_s30, 128  ;;  %p1147_p12 = scmp.lt.s32.totalorder %s19_s30, %s19_s30 }
  0x1c   :  { %p1143_p11 = scmp.ne.s32.totalorder %s19_s30, %s1142_s1  ;;  %p1148_p13 = scmp.lt.s32.totalorder %s1142_s1, %s1142_s1 }
  0x1e   :  { %p1149_p0 = por %p1148_p13, %p1147_p12 }
  0x20   :  { %p1150_p1 = pnand %p1149_p0, %p1143_p11 }
  0x22   :  { %1153 = shalt.err (!%p1150_p1)
}
  0x23   :  { %21 = dma.hbm_to_vmem [thread:$0]  %s1377_s0, 128, %s19_s30, [#allocation3]  }
  0x24   :  { %s1154_s18 = scalar_lea.hbm %s1379_s2, 6144 }
  0x25   :  { %p1155_p2 = scmp.ne.s32.totalorder %s1379_s2, %s1154_s18  ;;  %p1158_p3 = scmp.lt.u32.totalorder %s1154_s18, %s1379_s2 }
  0x27   :  { %p1160_p4 = pnand %p1158_p3, %p1155_p2 }
  0x29   :  { %1163 = shalt.err (!%p1160_p4)
}
  0x2a   :  { %s1164_s23 = scalar_lea.vmem %s40_s6, 6144  ;;  %p1169_p6 = scmp.lt.s32.totalorder %s40_s6, %s40_s6 }
  0x2b   :  { %p1165_p5 = scmp.ne.s32.totalorder %s40_s6, %s1164_s23  ;;  %p1170_p7 = scmp.lt.s32.totalorder %s1164_s23, %s1164_s23 }
  0x2d   :  { %p1171_p8 = por %p1170_p7, %p1169_p6 }
  0x2f   :  { %p1172_p9 = pnand %p1171_p8, %p1165_p5 }
  0x31   :  { %1175 = shalt.err (!%p1172_p9)
}
  0x32   :  { %45 = dma.hbm_to_vmem [thread:$0]  %s1379_s2, 6144, %s40_s6, [#allocation6], %s1205_s25, %s1205_s25, %s1206_s26  }
  0x33   :  { %1198 = dma.done.wait [#allocation3], 128  }
  0x34   :  { %1199 = vsyncadd [#allocation3], 4294967168 }
  0x35   :  { %1200 = dma.done.wait [#allocation6], 12288  }
  0x36   :  { %1201 = vsyncadd [#allocation6], 4294955008  ;;  %v1209_v0 = vmov 0.0|0.0   ;;  %vm1210_vm0 = vmmov 0   ;;  %v1211_v1 = vmov 0.0   ;;  %v58_v2 = vld [vmem:[#allocation5] sm:$0xff] }
  0x37   :  { %957 = vmatprep.subr.bf16.mxu0 %v1209_v0  ;;  %779 = vmatprep.mubr.msk.f32.mxu0 %vm1210_vm0, %v1211_v1  ;;  %v59_v3 = vld [vmem:[#allocation5 + $0x8] sm:$0xff]  ;;  %v60_v4 = vld [vmem:[#allocation5 + $0x10] sm:$0xff]  ;;  %v61_v6 = vld [vmem:[#allocation5 + $0x18] sm:$0xff]  ;;  %s1212_s10 = smov [#allocation8]  }
  0x38   :  { %981 = vmatprep.subr.bf16.mxu1 %v1209_v0  ;;  %814 = vmatprep.mubr.msk.f32.mxu1 %vm1210_vm0, %v1211_v1  ;;  %v958_v5 = vpack.c.bf16 %v59_v3, %v58_v2  ;;  %v961_v7 = vpack.c.bf16 %v61_v6, %v60_v4  ;;  %v62_v8 = vld [vmem:[#allocation5 + $0x20] sm:$0xff]  ;;  %v63_v9 = vld [vmem:[#allocation5 + $0x28] sm:$0xff]  ;;  %v152_v12 = vld [vmem:[#allocation7 + $0x10] sm:$0xff]  ;;  %s625_s11 = sshll.u32 %s1212_s10, 4  ;;  %s626_s11 = int_to_ptr.vmem [resolvable:$true] %s625_s11 }
  0x39   :  { %v150_v10 = vld [vmem:[#allocation7] sm:$0xff]  ;;  %v151_v11 = vld [vmem:[#allocation7 + $0x8] sm:$0xff]  ;;  %v153_v13 = vld [vmem:[#allocation7 + $0x18] sm:$0xff]  ;;  %v964_v14 = vpack.c.bf16 %v63_v9, %v62_v8  ;;  %s1176_s12 = scalar_lea.vmem %s626_s11, 128  ;;  %p1181_p11 = scmp.lt.s32.totalorder %s626_s11, %s626_s11 }
  0x3a   :  { %959 = vmatpush3.bf16.msra.mxu0 %v958_v5  ;;  %v982_v15 = vpack.c.bf16 %v151_v11, %v150_v10  ;;  %v64_v16 = vld [vmem:[#allocation5 + $0x30] sm:$0xff]  ;;  %v65_v17 = vld [vmem:[#allocation5 + $0x38] sm:$0xff]  ;;  %v985_v18 = vpack.c.bf16 %v153_v13, %v152_v12  ;;  %v154_v19 = vld [vmem:[#allocation7 + $0x20] sm:$0xff]  ;;  %p1177_p10 = scmp.ne.s32.totalorder %s626_s11, %s1176_s12  ;;  %p1182_p12 = scmp.lt.s32.totalorder %s1176_s12, %s1176_s12 }
  0x3b   :  { %960 = vmatprep.subr.bf16.mxu0 %v1209_v0  ;;  %v155_v20 = vld [vmem:[#allocation7 + $0x28] sm:$0xff]  ;;  %v967_v21 = vpack.c.bf16 %v65_v17, %v64_v16  ;;  %v66_v22 = vld [vmem:[#allocation5 + $0x40] sm:$0xff]  ;;  %v156_v25 = vld [vmem:[#allocation7 + $0x30] sm:$0xff] }
  0x3c   :  { %983 = vmatpush3.bf16.msra.mxu1 %v982_v15  ;;  %v67_v23 = vld [vmem:[#allocation5 + $0x48] sm:$0xff]  ;;  %v988_v24 = vpack.c.bf16 %v155_v20, %v154_v19  ;;  %v157_v26 = vld [vmem:[#allocation7 + $0x38] sm:$0xff]  ;;  %v68_v28 = vld [vmem:[#allocation5 + $0x50] sm:$0xff]  ;;  %p1183_p13 = por %p1182_p12, %p1181_p11 }
  0x3d   :  { %984 = vmatprep.subr.bf16.mxu1 %v1209_v0  ;;  %v970_v27 = vpack.c.bf16 %v67_v23, %v66_v22  ;;  %v69_v29 = vld [vmem:[#allocation5 + $0x58] sm:$0xff]  ;;  %v991_v30 = vpack.c.bf16 %v157_v26, %v156_v25  ;;  %v158_v31 = vld [vmem:[#allocation7 + $0x40] sm:$0xff]  ;;  %v159_v32 = vld [vmem:[#allocation7 + $0x48] sm:$0xff] }
  0x3e   :  { %962 = vmatpush3.bf16.msra.mxu0 %v961_v7  ;;  %v973_v33 = vpack.c.bf16 %v69_v29, %v68_v28  ;;  %v70_v34 = vld [vmem:[#allocation5 + $0x60] sm:$0xff]  ;;  %v71_v35 = vld [vmem:[#allocation5 + $0x68] sm:$0xff]  ;;  %v994_v36 = vpack.c.bf16 %v159_v32, %v158_v31  ;;  %v160_v37 = vld [vmem:[#allocation7 + $0x50] sm:$0xff]  ;;  %p1184_p0 = pnand %p1183_p13, %p1177_p10 }
  0x3f   :  { %963 = vmatprep.subr.bf16.mxu0 %v1209_v0  ;;  %v161_v38 = vld [vmem:[#allocation7 + $0x58] sm:$0xff]  ;;  %v976_v39 = vpack.c.bf16 %v71_v35, %v70_v34  ;;  %v72_v40 = vld [vmem:[#allocation5 + $0x70] sm:$0xff]  ;;  %v162_v43 = vld [vmem:[#allocation7 + $0x60] sm:$0xff] }
  0x40   :  { %986 = vmatpush3.bf16.msra.mxu1 %v985_v18  ;;  %v73_v41 = vld [vmem:[#allocation5 + $0x78] sm:$0xff]  ;;  %v997_v42 = vpack.c.bf16 %v161_v38, %v160_v37  ;;  %v163_v44 = vld [vmem:[#allocation7 + $0x68] sm:$0xff]  ;;  %v164_v48 = vld [vmem:[#allocation7 + $0x70] sm:$0xff] }
  0x41   :  { %987 = vmatprep.subr.bf16.mxu1 %v1209_v0  ;;  %v979_v45 = vpack.c.bf16 %v73_v41, %v72_v40  ;;  %v1000_v46 = vpack.c.bf16 %v163_v44, %v162_v43  ;;  %v57_v47 = vld [vmem:[#allocation2] sm:$0xff]  ;;  %v243_v51 = vld [vmem:[#allocation5 + $0x80] sm:$0xff]  ;;  %v244_v52 = vld [vmem:[#allocation5 + $0x88] sm:$0xff] }
  0x42   :  { %965 = vmatpush3.bf16.msra.mxu0 %v964_v14  ;;  %v165_v49 = vld [vmem:[#allocation7 + $0x78] sm:$0xff]  ;;  %v245_v53 = vld [vmem:[#allocation5 + $0x90] sm:$0xff]  ;;  %v1006_v54 = vpack.c.bf16 %v244_v52, %v243_v51  ;;  %v247_v57 = vld [vmem:[#allocation5 + $0xa0] sm:$0xff] }
  0x43   :  { %966 = vmatprep.subr.bf16.mxu0 %v1209_v0  ;;  %v1003_v50 = vpack.c.bf16 %v165_v49, %v164_v48  ;;  %v246_v55 = vld [vmem:[#allocation5 + $0x98] sm:$0xff]  ;;  %v248_v58 = vld [vmem:[#allocation5 + $0xa8] sm:$0xff]  ;;  %v249_v60 = vld [vmem:[#allocation5 + $0xb0] sm:$0xff] }
  0x44   :  { %989 = vmatpush3.bf16.msra.mxu1 %v988_v24  ;;  %v1009_v56 = vpack.c.bf16 %v246_v55, %v245_v53  ;;  %v1012_v59 = vpack.c.bf16 %v248_v58, %v247_v57  ;;  %v250_v61 = vld [vmem:[#allocation5 + $0xb8] sm:$0xff]  ;;  %v251_v63 = vld [vmem:[#allocation5 + $0xc0] sm:$0xff]  ;;  %v252_v2 = vld [vmem:[#allocation5 + $0xc8] sm:$0xff] }
  0x45   :  { %990 = vmatprep.subr.bf16.mxu1 %v1209_v0  ;;  %v1015_v62 = vpack.c.bf16 %v250_v61, %v249_v60  ;;  %v1018_v3 = vpack.c.bf16 %v252_v2, %v251_v63  ;;  %v253_v4 = vld [vmem:[#allocation5 + $0xd0] sm:$0xff]  ;;  %v254_v5 = vld [vmem:[#allocation5 + $0xd8] sm:$0xff]  ;;  %v255_v7 = vld [vmem:[#allocation5 + $0xe0] sm:$0xff] }
  0x46   :  { %968 = vmatpush3.bf16.msra.mxu0 %v967_v21  ;;  %v1021_v6 = vpack.c.bf16 %v254_v5, %v253_v4  ;;  %v256_v8 = vld [vmem:[#allocation5 + $0xe8] sm:$0xff]  ;;  %v635_v10 = vld [vmem:[%s1380_s3] ss:$0 sm:$0xff]  ;;  %v257_v15 = vld [vmem:[#allocation5 + $0xf0] sm:$0xff] }
  0x47   :  { %969 = vmatprep.subr.bf16.mxu0 %v1209_v0  ;;  %v1024_v9 = vpack.c.bf16 %v256_v8, %v255_v7  ;;  %v258_v16 = vld [vmem:[#allocation5 + $0xf8] sm:$0xff]  ;;  %v337_v18 = vld [vmem:[#allocation7 + $0x80] sm:$0xff]  ;;  %v338_v19 = vld [vmem:[#allocation7 + $0x88] sm:$0xff] }
  0x48   :  { %992 = vmatpush3.bf16.msra.mxu1 %v991_v30  ;;  %v1027_v17 = vpack.c.bf16 %v258_v16, %v257_v15  ;;  %v339_v20 = vld [vmem:[#allocation7 + $0x90] sm:$0xff]  ;;  %v1030_v21 = vpack.c.bf16 %v338_v19, %v337_v18  ;;  %v340_v22 = vld [vmem:[#allocation7 + $0x98] sm:$0xff]  ;;  %v341_v24 = vld [vmem:[#allocation7 + $0xa0] sm:$0xff] }
  0x49   :  { %993 = vmatprep.subr.bf16.mxu1 %v1209_v0  ;;  %v1033_v23 = vpack.c.bf16 %v340_v22, %v339_v20  ;;  %v342_v25 = vld [vmem:[#allocation7 + $0xa8] sm:$0xff]  ;;  %v344_v28 = vld [vmem:[#allocation7 + $0xb8] sm:$0xff]  ;;  %v345_v30 = vld [vmem:[#allocation7 + $0xc0] sm:$0xff] }
  0x4a   :  { %971 = vmatpush3.bf16.msra.mxu0 %v970_v27  ;;  %v1036_v26 = vpack.c.bf16 %v342_v25, %v341_v24  ;;  %v343_v27 = vld [vmem:[#allocation7 + $0xb0] sm:$0xff]  ;;  %v346_v31 = vld [vmem:[#allocation7 + $0xc8] sm:$0xff]  ;;  %v348_v34 = vld [vmem:[#allocation7 + $0xd8] sm:$0xff] }
  0x4b   :  { %972 = vmatprep.subr.bf16.mxu0 %v1209_v0  ;;  %v1039_v29 = vpack.c.bf16 %v344_v28, %v343_v27  ;;  %v1042_v32 = vpack.c.bf16 %v346_v31, %v345_v30  ;;  %v350_v37 = vld [vmem:[#allocation7 + $0xe8] sm:$0xff]  ;;  %v351_v44 = vld [vmem:[#allocation7 + $0xf0] sm:$0xff]  ;;  %v434_v51 = vld [vmem:[#allocation5 + $0x118] sm:$0xff] }
  0x4c   :  { %995 = vmatpush3.bf16.msra.mxu1 %v994_v36  ;;  %v349_v36 = vld [vmem:[#allocation7 + $0xe0] sm:$0xff]  ;;  %v432_v48 = vld [vmem:[#allocation5 + $0x108] sm:$0xff]  ;;  %v433_v49 = vld [vmem:[#allocation5 + $0x110] sm:$0xff] }
  0x4d   :  { %996 = vmatprep.subr.bf16.mxu1 %v1209_v0  ;;  %v1048_v38 = vpack.c.bf16 %v350_v37, %v349_v36  ;;  %v1057_v52 = vpack.c.bf16 %v434_v51, %v433_v49  ;;  %v435_v53 = vld [vmem:[#allocation5 + $0x120] sm:$0xff]  ;;  %v438_v57 = vld [vmem:[#allocation5 + $0x138] sm:$0xff]  ;;  %v440_v60 = vld [vmem:[#allocation5 + $0x148] sm:$0xff] }
  0x4e   :  { %974 = vmatpush3.bf16.msra.mxu0 %v973_v33  ;;  %v347_v33 = vld [vmem:[#allocation7 + $0xd0] sm:$0xff]  ;;  %v442_v63 = vld [vmem:[#allocation5 + $0x158] sm:$0xff]  ;;  %v443_v8 = vld [vmem:[#allocation5 + $0x160] sm:$0xff] }
  0x4f   :  { %975 = vmatprep.subr.bf16.mxu0 %v1209_v0  ;;  %v1045_v35 = vpack.c.bf16 %v348_v34, %v347_v33  ;;  %v526_v15 = vld [vmem:[#allocation7 + $0x108] sm:$0xff]  ;;  %v527_v16 = vld [vmem:[#allocation7 + $0x110] sm:$0xff]  ;;  %v528_v18 = vld [vmem:[#allocation7 + $0x118] sm:$0xff] }
  0x50   :  { %998 = vmatpush3.bf16.msra.mxu1 %v997_v42  ;;  %v1081_v19 = vpack.c.bf16 %v528_v18, %v527_v16  ;;  %v530_v20 = vld [vmem:[#allocation7 + $0x128] sm:$0xff]  ;;  %v531_v22 = vld [vmem:[#allocation7 + $0x130] sm:$0xff]  ;;  %v533_v25 = vld [vmem:[#allocation7 + $0x140] sm:$0xff] }
  0x51   :  { %999 = vmatprep.subr.bf16.mxu1 %v1209_v0  ;;  %v535_v28 = vld [vmem:[#allocation7 + $0x150] sm:$0xff]  ;;  %v537_v31 = vld [vmem:[#allocation7 + $0x160] sm:$0xff]  ;;  %v640_v34 = vld [vmem:[%s1380_s3 + $0x3] ss:$0 sm:$0xff] }
  0x52   :  { %977 = vmatpush3.bf16.msra.mxu0 %v976_v39  ;;  %v636_v39 = vld [vmem:[%s1380_s3 + $0x1] ss:$0 sm:$0xff]  ;;  %v644_v49 = vld [vmem:[%s1380_s3 + $0x5] ss:$0 sm:$0xff] }
  0x53   :  { %978 = vmatprep.subr.bf16.mxu0 %v1209_v0 }
  0x54   :  { %1001 = vmatpush3.bf16.msra.mxu1 %v1000_v46 }
  0x55   :  { %1002 = vmatprep.subr.bf16.mxu1 %v1209_v0 }
  0x56   :  { %980 = vmatpush3.bf16.msra.mxu0 %v979_v45  ;;  %v352_v45 = vld [vmem:[#allocation7 + $0xf8] sm:$0xff] }
  0x57   :  { %1005 = vmatprep.subr.bf16.mxu0 %v1209_v0  ;;  %v1051_v46 = vpack.c.bf16 %v352_v45, %v351_v44 }
  0x58   :  { %1004 = vmatpush3.bf16.msra.mxu1 %v1003_v50 }
  0x59   :  { %780 = vmatmul.mubr.f32.vlgmr.msra.gmra.mrb[0].mxu0 %v57_v47  ;;  %1029 = vmatprep.subr.bf16.mxu1 %v1209_v0  ;;  %v431_v47 = vld [vmem:[#allocation5 + $0x100] sm:$0xff] }
  0x5a   :  { %849 = vmatprep.mubr.msk.f32.mxu0 %vm1210_vm0, %v1211_v1  ;;  %1007 = vmatpush3.bf16.msra.mxu0 %v1006_v54  ;;  %v1054_v50 = vpack.c.bf16 %v432_v48, %v431_v47  ;;  %v436_v54 = vld [vmem:[#allocation5 + $0x128] sm:$0xff] }
  0x5b   :  { %1008 = vmatprep.subr.bf16.mxu0 %v1209_v0  ;;  %v1060_v55 = vpack.c.bf16 %v436_v54, %v435_v53 }
  0x5e   :  { %1010 = vmatpush3.bf16.msra.mxu0 %v1009_v56  ;;  %v437_v56 = vld [vmem:[#allocation5 + $0x130] sm:$0xff] }
  0x5f   :  { %1011 = vmatprep.subr.bf16.mxu0 %v1209_v0  ;;  %v1063_v58 = vpack.c.bf16 %v438_v57, %v437_v56 }
  0x62   :  { %1013 = vmatpush3.bf16.msra.mxu0 %v1012_v59  ;;  %v439_v59 = vld [vmem:[#allocation5 + $0x140] sm:$0xff] }
  0x63   :  { %1014 = vmatprep.subr.bf16.mxu0 %v1209_v0  ;;  %v1066_v61 = vpack.c.bf16 %v440_v60, %v439_v59 }
  0x66   :  { %1016 = vmatpush3.bf16.msra.mxu0 %v1015_v62  ;;  %v441_v62 = vld [vmem:[#allocation5 + $0x150] sm:$0xff] }
  0x67   :  { %1017 = vmatprep.subr.bf16.mxu0 %v1209_v0  ;;  %v1069_v2 = vpack.c.bf16 %v442_v63, %v441_v62 }
  0x6a   :  { %1019 = vmatpush3.bf16.msra.mxu0 %v1018_v3  ;;  %v638_v3 = vld [vmem:[%s1380_s3 + $0x2] ss:$0 sm:$0xff] }
  0x6b   :  { %1020 = vmatprep.subr.bf16.mxu0 %v1209_v0 }
  0x6e   :  { %1022 = vmatpush3.bf16.msra.mxu0 %v1021_v6 }
  0x6f   :  { %1023 = vmatprep.subr.bf16.mxu0 %v1209_v0 }
  0x72   :  { %1025 = vmatpush3.bf16.msra.mxu0 %v1024_v9  ;;  %v444_v9 = vld [vmem:[#allocation5 + $0x168] sm:$0xff] }
  0x73   :  { %1026 = vmatprep.subr.bf16.mxu0 %v1209_v0 }
  0x76   :  { %1028 = vmatpush3.bf16.msra.mxu0 %v1027_v17 }
  0x77   :  { %1053 = vmatprep.subr.bf16.mxu0 %v1209_v0 }
 0x12c   :  { %v145_v11 = vpop.f32.mrb[0].mxu0 }
 0x12d   :  { %v146_v12 = vadd.f32 %v635_v10, %v145_v11  ;;  %v781_v13 = vpop.f32.mrb[1].mxu0  ;;  %v1072_v10 = vpack.c.bf16 %v444_v9, %v443_v8  ;;  %v445_v11 = vld [vmem:[#allocation5 + $0x170] sm:$0xff] }
 0x12f   :  { %v149_v14 = vmax.f32 %v146_v12, 0.0  ;;  %v446_v12 = vld [vmem:[#allocation5 + $0x178] sm:$0xff] }
 0x130   :  { %v1075_v13 = vpack.c.bf16 %v446_v12, %v445_v11 }
 0x131   :  { %815 = vmatmul.mubr.f32.vlgmr.msra.gmra.mrb[0].mxu1 %v149_v14  ;;  %v525_v14 = vld [vmem:[#allocation7 + $0x100] sm:$0xff] }
 0x132   :  { %884 = vmatprep.mubr.msk.f32.mxu1 %vm1210_vm0, %v1211_v1  ;;  %1031 = vmatpush3.bf16.msra.mxu1 %v1030_v21  ;;  %v1078_v17 = vpack.c.bf16 %v526_v15, %v525_v14 }
 0x133   :  { %1032 = vmatprep.subr.bf16.mxu1 %v1209_v0 }
 0x136   :  { %1034 = vmatpush3.bf16.msra.mxu1 %v1033_v23  ;;  %v532_v23 = vld [vmem:[#allocation7 + $0x138] sm:$0xff] }
 0x137   :  { %1035 = vmatprep.subr.bf16.mxu1 %v1209_v0  ;;  %v1087_v24 = vpack.c.bf16 %v532_v23, %v531_v22 }
 0x13a   :  { %1037 = vmatpush3.bf16.msra.mxu1 %v1036_v26  ;;  %v534_v26 = vld [vmem:[#allocation7 + $0x148] sm:$0xff] }
 0x13b   :  { %1038 = vmatprep.subr.bf16.mxu1 %v1209_v0  ;;  %v1090_v27 = vpack.c.bf16 %v534_v26, %v533_v25 }
 0x13e   :  { %1040 = vmatpush3.bf16.msra.mxu1 %v1039_v29  ;;  %v536_v29 = vld [vmem:[#allocation7 + $0x158] sm:$0xff] }
 0x13f   :  { %1041 = vmatprep.subr.bf16.mxu1 %v1209_v0  ;;  %v1093_v30 = vpack.c.bf16 %v536_v29, %v535_v28 }
 0x142   :  { %1043 = vmatpush3.bf16.msra.mxu1 %v1042_v32  ;;  %v538_v32 = vld [vmem:[#allocation7 + $0x168] sm:$0xff] }
 0x143   :  { %1044 = vmatprep.subr.bf16.mxu1 %v1209_v0  ;;  %v1096_v33 = vpack.c.bf16 %v538_v32, %v537_v31 }
 0x146   :  { %1046 = vmatpush3.bf16.msra.mxu1 %v1045_v35 }
 0x147   :  { %1047 = vmatprep.subr.bf16.mxu1 %v1209_v0 }
 0x14a   :  { %1049 = vmatpush3.bf16.msra.mxu1 %v1048_v38 }
 0x14b   :  { %1050 = vmatprep.subr.bf16.mxu1 %v1209_v0 }
 0x14e   :  { %1052 = vmatpush3.bf16.msra.mxu1 %v1051_v46 }
 0x14f   :  { %1077 = vmatprep.subr.bf16.mxu1 %v1209_v0 }
 0x204   :  { %v237_v40 = vpop.f32.mrb[0].mxu1 }
 0x205   :  { %v1327_v41 = vadd.f32 %v636_v39, %v237_v40  ;;  %v816_v42 = vpop.f32.mrb[1].mxu1  ;;  %v539_v40 = vld [vmem:[#allocation7 + $0x170] sm:$0xff] }
 0x206   :  { %v540_v42 = vld [vmem:[#allocation7 + $0x178] sm:$0xff] }
 0x207   :  { %v241_v43 = vmax.f32 %v1327_v41, 0.0  ;;  %v1099_v44 = vpack.c.bf16 %v540_v42, %v539_v40 }
 0x209   :  { %850 = vmatmul.mubr.f32.vlgmr.msra.gmra.mrb[2].mxu0 %v241_v43 }
 0x20a   :  { %919 = vmatprep.mubr.msk.f32.mxu0 %vm1210_vm0, %v1211_v1  ;;  %1055 = vmatpush3.bf16.msra.mxu0 %v1054_v50 }
 0x20b   :  { %1056 = vmatprep.subr.bf16.mxu0 %v1209_v0 }
 0x20e   :  { %1058 = vmatpush3.bf16.msra.mxu0 %v1057_v52 }
 0x20f   :  { %1059 = vmatprep.subr.bf16.mxu0 %v1209_v0 }
 0x212   :  { %1061 = vmatpush3.bf16.msra.mxu0 %v1060_v55 }
 0x213   :  { %1062 = vmatprep.subr.bf16.mxu0 %v1209_v0 }
 0x216   :  { %1064 = vmatpush3.bf16.msra.mxu0 %v1063_v58 }
 0x217   :  { %1065 = vmatprep.subr.bf16.mxu0 %v1209_v0 }
 0x21a   :  { %1067 = vmatpush3.bf16.msra.mxu0 %v1066_v61 }
 0x21b   :  { %1068 = vmatprep.subr.bf16.mxu0 %v1209_v0 }
 0x21e   :  { %1070 = vmatpush3.bf16.msra.mxu0 %v1069_v2 }
 0x21f   :  { %1071 = vmatprep.subr.bf16.mxu0 %v1209_v0 }
 0x222   :  { %1073 = vmatpush3.bf16.msra.mxu0 %v1072_v10 }
 0x223   :  { %1074 = vmatprep.subr.bf16.mxu0 %v1209_v0 }
 0x226   :  { %1076 = vmatpush3.bf16.msra.mxu0 %v1075_v13 }
 0x2dc   :  { %v331_v4 = vpop.f32.mrb[2].mxu0 }
 0x2dd   :  { %v332_v5 = vadd.f32 %v638_v3, %v331_v4  ;;  %v851_v6 = vpop.f32.mrb[3].mxu0 }
 0x2df   :  { %v335_v7 = vmax.f32 %v332_v5, 0.0 }
 0x2e1   :  { %885 = vmatmul.mubr.f32.vlgmr.msra.gmra.mrb[2].mxu1 %v335_v7 }
 0x2e2   :  { %954 = vmatprep.mubr.msk.f32.mxu1 %vm1210_vm0, %v1211_v1  ;;  %1079 = vmatpush3.bf16.msra.mxu1 %v1078_v17  ;;  %v529_v1 = vld [vmem:[#allocation7 + $0x120] sm:$0xff] }
 0x2e3   :  { %1080 = vmatprep.subr.bf16.mxu1 %v1209_v0  ;;  %v1084_v21 = vpack.c.bf16 %v530_v20, %v529_v1 }
 0x2e6   :  { %1082 = vmatpush3.bf16.msra.mxu1 %v1081_v19 }
 0x2e7   :  { %1083 = vmatprep.subr.bf16.mxu1 %v1209_v0 }
 0x2ea   :  { %1085 = vmatpush3.bf16.msra.mxu1 %v1084_v21 }
 0x2eb   :  { %1086 = vmatprep.subr.bf16.mxu1 %v1209_v0 }
 0x2ee   :  { %1088 = vmatpush3.bf16.msra.mxu1 %v1087_v24 }
 0x2ef   :  { %1089 = vmatprep.subr.bf16.mxu1 %v1209_v0 }
 0x2f2   :  { %1091 = vmatpush3.bf16.msra.mxu1 %v1090_v27 }
 0x2f3   :  { %1092 = vmatprep.subr.bf16.mxu1 %v1209_v0 }
 0x2f6   :  { %1094 = vmatpush3.bf16.msra.mxu1 %v1093_v30 }
 0x2f7   :  { %1095 = vmatprep.subr.bf16.mxu1 %v1209_v0 }
 0x2fa   :  { %1097 = vmatpush3.bf16.msra.mxu1 %v1096_v33 }
 0x2fb   :  { %1098 = vmatprep.subr.bf16.mxu1 %v1209_v0  ;;  %v642_v0 = vld [vmem:[%s1380_s3 + $0x4] ss:$0 sm:$0xff] }
 0x2fe   :  { %1100 = vmatpush3.bf16.msra.mxu1 %v1099_v44 }
 0x3b4   :  { %v424_v35 = vpop.f32.mrb[2].mxu1 }
 0x3b5   :  { %v425_v36 = vadd.f32 %v640_v34, %v424_v35  ;;  %v886_v37 = vpop.f32.mrb[3].mxu1 }
 0x3b7   :  { %v428_v38 = vmax.f32 %v425_v36, 0.0 }
 0x3b9   :  { %v429_v39 = vadd.f32 %v428_v38, %v241_v43 }
 0x3bb   :  { %920 = vmatmul.mubr.f32.vlgmr.msra.gmra.mrb[4].mxu0 %v429_v39 }
 0x48e   :  { %v519_v45 = vpop.f32.mrb[4].mxu0 }
 0x48f   :  { %v520_v46 = vadd.f32 %v642_v0, %v519_v45  ;;  %v921_v47 = vpop.f32.mrb[5].mxu0 }
 0x491   :  { %v523_v48 = vmax.f32 %v520_v46, 0.0 }
 0x493   :  { %955 = vmatmul.mubr.f32.vlgmr.msra.gmra.mrb[4].mxu1 %v523_v48 }
 0x566   :  { %v612_v41 = vpop.f32.mrb[4].mxu1 }
 0x567   :  { %v613_v43 = vadd.f32 %v644_v49, %v612_v41  ;;  %v956_v50 = vpop.f32.mrb[5].mxu1 }
 0x569   :  { %v616_v51 = vmax.f32 %v613_v43, 0.0 }
 0x56b   :  { %v617_v52 = vadd.f32 %v616_v51, %v429_v39 }
 0x56d   :  { %618 = vst [vmem:[#allocation8] sm:$0xff] %v617_v52 }
 0x56e   :  { %1187 = shalt.err (!%p1184_p0)
}
 0x56f   :  { %s1188_s3 = scalar_lea.hbm %s1381_s4, 128 }
 0x570   :  { %p1189_p1 = scmp.ne.s32.totalorder %s1381_s4, %s1188_s3  ;;  %p1192_p2 = scmp.lt.u32.totalorder %s1188_s3, %s1381_s4 }
 0x572   :  { %p1194_p3 = pnand %p1192_p2, %p1189_p1 }
 0x574   :  { %1197 = shalt.err (!%p1194_p3)
}
 0x575   :  { %628 = dma.vmem_to_hbm [thread:$0]  %s626_s11, 128, %s1381_s4, [#allocation4]  }
 0x576   :  { %1202 = dma.done.wait [#allocation4], 128  }
 0x577   :  { %1203 = vsyncadd [#allocation4], 4294967168 }
 0x578   :  { %632 = vsyncpa [#allocation3], 1 }
 0x579   :  { %633 = vsyncpa [#allocation6], 1 }
 0x57a   :  { %634 = vsyncpa [#allocation4], 1 }

</bundles_post_ra>
